<compile_context>
chip_gen: v5e
topology: v5e:2x2
jax: 0.10.0
libtpu: 0.0.40
codegen_flags: <defaults>
</compile_context>

<pallas_src>
import functools

import jax
import jax.numpy as jnp
from jax.experimental import pallas as pl
from jax.experimental.pallas import tpu as pltpu

_LANE_COLS = 1024            # lane-dense flattened last dim (multiple of 128)
_SMALL_THRESHOLD = 128 * 1024  # elements; below this, XLA fusion wins


def _tpu_config():
    """Static per-generation tiling config (bytes per stream per block,
    VMEM limit for the kernel, minimum grid steps for multi-TC parts)."""
    try:
        kind = jax.devices()[0].device_kind.lower()
    except Exception:  # pragma: no cover - defensive
        kind = ""
    if "v7" in kind:
        # 64 MiB VMEM per TC, 2 TCs: keep resident footprint modest and make
        # sure the grid has enough steps for both TensorCores.
        return dict(tile_bytes=4 << 20, vmem_limit=40 << 20, min_grid_steps=4)
    if "v5" in kind or "v6" in kind:
        # 128 MiB VMEM, single TC: big blocks to amortize per-step overhead.
        return dict(tile_bytes=8 << 20, vmem_limit=80 << 20, min_grid_steps=1)
    # Unknown generation: conservative (matches the previously-validated run).
    return dict(tile_bytes=2 << 20, vmem_limit=32 << 20, min_grid_steps=1)


_CFG = _tpu_config()


def _foo_kernel(x_ref, n_ref, m_ref, o_ref):
    # Elementwise fused multiply-add on the VPU: out = n * x + m
    o_ref[...] = n_ref[...] * x_ref[...] + m_ref[...]


def _row_tile(rows, cols, itemsize):
    """Rows per block: fits the per-stream VMEM budget, is a multiple of 8
    whenever the rows axis is actually tiled (else equals the full row count),
    and on multi-TC parts is shrunk so the grid has >= min_grid_steps steps."""
    budget_rows = _CFG["tile_bytes"] // max(1, cols * itemsize)
    if budget_rows < 8:
        # Even an 8-row block exceeds the per-stream budget (huge last dim):
        # only safe as a single whole-array block, otherwise bail out.
        if rows * cols * itemsize * 8 <= _CFG["vmem_limit"]:
            return rows
        return None
    tile = min(rows, budget_rows)
    steps = _CFG["min_grid_steps"]
    if steps > 1 and rows > 8 * steps:
        tile = min(tile, -(-rows // steps))  # ceil(rows / steps)
    if tile < rows:
        tile = max(8, (tile // 8) * 8)       # tiled axis must be multiple of 8
    return tile


def _foo_pallas_2d(x2, n2, m2, row_tile):
    rows, cols = x2.shape
    spec = pl.BlockSpec((row_tile, cols), lambda i: (i, 0))
    return pl.pallas_call(
        _foo_kernel,
        out_shape=jax.ShapeDtypeStruct((rows, cols), x2.dtype),
        grid=(pl.cdiv(rows, row_tile),),
        in_specs=[spec, spec, spec],
        out_specs=spec,
        compiler_params=pltpu.CompilerParams(
            dimension_semantics=("parallel",),
            vmem_limit_bytes=_CFG["vmem_limit"],
        ),
    )(x2, n2, m2)


@functools.partial(jax.jit, static_argnames=("force_pallas",))
def foo_forward(x, n, m, *, force_pallas=False):
    """out = n * x + m, all arrays the same shape/dtype (Foo.forward)."""
    assert x.shape == n.shape == m.shape
    orig_shape = x.shape
    total = x.size
    itemsize = jnp.dtype(x.dtype).itemsize

    # Tiny inputs: a kernel launch (+DMA setup) costs more than the math.
    if total < _SMALL_THRESHOLD and not force_pallas:
        return n * x + m

    if total % _LANE_COLS == 0:
        # Aligned path: free (bitcast) reshape to a lane-dense (rows, 1024)
        # view. No padding — Pallas masks the partial last row-block.
        rows, cols = total // _LANE_COLS, _LANE_COLS
    elif x.ndim >= 2:
        # Ragged path: tile the original array (collapsed to 2-D). Block last
        # dim == full array last dim, so no pad/slice copies; just a few
        # masked lane stores when the last dim isn't a multiple of 128.
        rows, cols = total // orig_shape[-1], orig_shape[-1]
    else:
        rows, cols = 1, total

    row_tile = _row_tile(rows, cols, itemsize)
    if row_tile is None:
        # A single row is too wide for VMEM; leave it to XLA's fusion.
        return n * x + m

    out2 = _foo_pallas_2d(
        x.reshape(rows, cols), n.reshape(rows, cols), m.reshape(rows, cols),
        row_tile)
    return out2.reshape(orig_shape)


if __name__ == "__main__":
    key = jax.random.PRNGKey(0)

    # 1) Module's toy parameter size (8, 32) with n = m = ones (matches
    #    torch.ones(size) init). Forced through the ragged single-block
    #    Pallas path to exercise the kernel at the module's own shape.
    small = (8, 32)
    x_s = jax.random.normal(key, small, dtype=jnp.float32)
    n_s = jnp.ones(small, dtype=jnp.float32)
    m_s = jnp.ones(small, dtype=jnp.float32)
    out_s = jax.block_until_ready(foo_forward(x_s, n_s, m_s, force_pallas=True))
    assert out_s.shape == small
    assert jnp.allclose(out_s, n_s * x_s + m_s, atol=1e-6), "small-shape mismatch"

    def run_case(idx, shape):
        kx, kn, km = jax.random.split(jax.random.fold_in(key, idx), 3)
        x = jax.random.normal(kx, shape, dtype=jnp.float32)
        n = jax.random.normal(kn, shape, dtype=jnp.float32)
        m = jax.random.normal(km, shape, dtype=jnp.float32)
        out = jax.block_until_ready(foo_forward(x, n, m, force_pallas=True))
        ref = n * x + m
        assert out.shape == shape
        assert jnp.allclose(out, ref, atol=1e-5), f"mismatch at shape {shape}"

    # 2) Aligned flatten path: total % 1024 == 0, multi-step grid with a
    #    partial (masked) last row-block — no padding, no output slice.
    run_case(1, (2056, 1024))

    # 3) Ragged path: last dim not a multiple of 128 (masked lane stores),
    #    no wrapper-side pad/copy.
    run_case(2, (136, 520))

    print("KERNEL_OK")
</pallas_src>

<mosaic_0001>
module attributes {stable_mosaic.version = 11 : i64} {
  func.func @_foo_kernel(%arg0: i32, %arg1: memref<8x32xf32, #tpu.memory_space<vmem>>, %arg2: memref<8x32xf32, #tpu.memory_space<vmem>>, %arg3: memref<8x32xf32, #tpu.memory_space<vmem>>, %arg4: memref<8x32xf32, #tpu.memory_space<vmem>>) attributes {dimension_semantics = [#tpu.dimension_semantics<parallel>], iteration_bounds = array<i64: 1>, scalar_prefetch = 0 : i64, scratch_operands = 0 : i64, tpu.core_type = #tpu.core_type<tc>, window_params = [{transform_indices = @transform_0, window_bounds = array<i64: 8, 32>}, {transform_indices = @transform_1, window_bounds = array<i64: 8, 32>}, {transform_indices = @transform_2, window_bounds = array<i64: 8, 32>}, {transform_indices = @transform_3, window_bounds = array<i64: 8, 32>}]} {
    %c0 = arith.constant 0 : index
    %c0_0 = arith.constant 0 : index
    %0 = vector.load %arg2[%c0, %c0_0] : memref<8x32xf32, #tpu.memory_space<vmem>>, vector<8x32xf32>
    %c0_1 = arith.constant 0 : index
    %c0_2 = arith.constant 0 : index
    %1 = vector.load %arg1[%c0_1, %c0_2] : memref<8x32xf32, #tpu.memory_space<vmem>>, vector<8x32xf32>
    %2 = arith.mulf %0, %1 : vector<8x32xf32>
    %c0_3 = arith.constant 0 : index
    %c0_4 = arith.constant 0 : index
    %3 = vector.load %arg3[%c0_3, %c0_4] : memref<8x32xf32, #tpu.memory_space<vmem>>, vector<8x32xf32>
    %4 = arith.addf %2, %3 : vector<8x32xf32>
    %c0_5 = arith.constant 0 : index
    %c0_6 = arith.constant 0 : index
    %5 = vector.load %arg4[%c0_5, %c0_6] : memref<8x32xf32, #tpu.memory_space<vmem>>, vector<8x32xf32>
    tpu.vector_store %arg4[%c0_5, %c0_6], %4 {strides = array<i32>} : memref<8x32xf32, #tpu.memory_space<vmem>>, vector<8x32xf32>,
    return
  }
  func.func @transform_0(%arg0: i32) -> (i32, i32) {
    %c0_i32 = arith.constant 0 : i32
    %c0_i32_0 = arith.constant 0 : i32
    return %arg0, %c0_i32 : i32, i32
  }
  func.func @transform_1(%arg0: i32) -> (i32, i32) {
    %c0_i32 = arith.constant 0 : i32
    %c0_i32_0 = arith.constant 0 : i32
    return %arg0, %c0_i32 : i32, i32
  }
  func.func @transform_2(%arg0: i32) -> (i32, i32) {
    %c0_i32 = arith.constant 0 : i32
    %c0_i32_0 = arith.constant 0 : i32
    return %arg0, %c0_i32 : i32, i32
  }
  func.func @transform_3(%arg0: i32) -> (i32, i32) {
    %c0_i32 = arith.constant 0 : i32
    %c0_i32_0 = arith.constant 0 : i32
    return %arg0, %c0_i32 : i32, i32
  }
}

</mosaic_0001>

<bundles_post_ra>
// kernel: foo_forward.1
= control target key start
LH: loop header
LB: loop body
LE: loop exit
PB: predicated region body
PF: predicated region fallthrough
CT: control target
= control target key end

     0   :  { %8 = vsyncpa [#allocation3], 0  ;;  %s223_s0 = inlined_call_operand.hbm [shape: f32[8,32], index: 0, kind: input, shape index: {}]   ;;  %s224_s1 = inlined_call_operand.hbm [shape: f32[8,32], index: 1, kind: input, shape index: {}]   ;;  %s225_s2 = inlined_call_operand.hbm [shape: f32[8,32], index: 2, kind: input, shape index: {}]   ;;  %s226_s3 = inlined_call_operand.hbm [shape: f32[8,32], index: 3, kind: output, shape index: {}]  }
   0x1   :  { %9 = vsyncpa [#allocation6], 0  ;;  %s27_s14 = sshll.u32 %s224_s1, 4  ;;  %s28_s14 = int_to_ptr.hbm [resolvable:$true] %s27_s14 }
   0x2   :  { %10 = vsyncpa [#allocation4], 0  ;;  %s187_s15 = smov [#allocation5]   ;;  %s16_s19 = sshll.u32 %s223_s0, 4  ;;  %s17_s19 = int_to_ptr.hbm [resolvable:$true] %s16_s19 }
   0x3   :  { %s29_s16 = sshll.u32 %s187_s15, 4  ;;  %s188_s20 = smov [#allocation2]   ;;  %s30_s16 = int_to_ptr.vmem [resolvable:$true] %s29_s16 }
   0x4   :  { %32 = dma.hbm_to_vmem [thread:$0]  %s28_s14, 128, %s30_s16, [#allocation6]  }
   0x5   :  { %s18_s21 = sshll.u32 %s188_s20, 4  ;;  %s38_s24 = sshll.u32 %s225_s2, 4  ;;  %s19_s21 = int_to_ptr.vmem [resolvable:$true] %s18_s21  ;;  %s39_s24 = int_to_ptr.hbm [resolvable:$true] %s38_s24 }
   0x6   :  { %21 = dma.hbm_to_vmem [thread:$0]  %s17_s19, 128, %s19_s21, [#allocation3]  }
   0x7   :  { %s189_s1 = smov [#allocation7]  }
   0x8   :  { %s40_s25 = sshll.u32 %s189_s1, 4  ;;  %s41_s25 = int_to_ptr.vmem [resolvable:$true] %s40_s25 }
   0x9   :  { %43 = dma.hbm_to_vmem [thread:$0]  %s39_s24, 128, %s41_s25, [#allocation6]  }
   0xa   :  { %181 = dma.done.wait [#allocation3], 128  }
   0xb   :  { %182 = vsyncadd [#allocation3], 4294967168 }
   0xc   :  { %183 = dma.done.wait [#allocation6], 256  }
   0xd   :  { %184 = vsyncadd [#allocation6], 4294967040  ;;  %v56_v0 = vld [vmem:[#allocation5] sm:$0xff]  ;;  %v57_v1 = vld [vmem:[#allocation2] sm:$0xff]  ;;  %s190_s0 = smov [#allocation8]   ;;  %s70_s2 = sshll.u32 %s226_s3, 4  ;;  %s71_s2 = int_to_ptr.hbm [resolvable:$true] %s70_s2 }
   0xe   :  { %v59_v2 = vld [vmem:[#allocation7] sm:$0xff]  ;;  %s68_s26 = sshll.u32 %s190_s0, 4  ;;  %v58_v3 = vmul.f32 %v57_v1, %v56_v0  ;;  %vm61_vm0 = vcmask 261120   ;;  %s69_s26 = int_to_ptr.vmem [resolvable:$true] %s68_s26 }
  0x10   :  { %v60_v4 = vadd.f32 %v59_v2, %v58_v3 }
  0x12   :  { %62 = vst.msk [vmem:[#allocation8] sm:$0xff] %vm61_vm0, %v60_v4 }
  0x13   :  { %73 = dma.vmem_to_hbm [thread:$0]  %s69_s26, 128, %s71_s2, [#allocation4]  }
  0x14   :  { %185 = dma.done.wait [#allocation4], 128  }
  0x15   :  { %186 = vsyncadd [#allocation4], 4294967168 }
  0x16   :  { %78 = vsyncpa [#allocation3], 1 }
  0x17   :  { %79 = vsyncpa [#allocation6], 1 }
  0x18   :  { %80 = vsyncpa [#allocation4], 1 }

</bundles_post_ra>
